<compile_context>
chip_gen: v7x
topology: tpu7x:2x2x1
jax: 0.10.0
libtpu: 0.0.40
codegen_flags: <defaults>
</compile_context>

<pallas_src>
import jax
import jax.numpy as jnp
from jax.experimental import pallas as pl
from jax.experimental.pallas import tpu as pltpu

# ------------------------- static configuration -------------------------
B, C, H, W = 2, 4, 16, 16          # input (NCHW, like PyTorch)
P = 4                              # patch size of synthetic backbone
N = (H // P) * (W // P)            # number of tokens = 16
CP = C * P * P                     # patch feature dim = 64
CHW = C * H * W                    # flattened image = 1024
D = 32                             # embed dim == linInShape
HID = 32                           # intermediateLinearLayerShape
OUT = 8                            # outShape (yShape[1])
OUT_PAD = 128                      # lane-dense padded output width
BPAD = 8                           # batch padded to full sublane count
LN_EPS = 1e-6

# packed constant-slab row layout (all starts are 8-aligned)
ROW_WPOOL = 0                      # rows [0, 1024):    W_pool  (cols :D)
ROW_W1 = ROW_WPOOL + CHW           # rows [1024, 1056): w1'     (cols :HID)
ROW_W2 = ROW_W1 + D                # rows [1056, 1088): w2_pad  (cols :128)
ROW_BIAS = ROW_W2 + HID            # rows [1088, 1096): bias rows
R_TOTAL = ROW_BIAS + 8             # 1096 (multiple of 8)


# ------------------------------- kernel --------------------------------
def fused_forward_kernel(x_ref, slab_ref, out_ref):
    """x_ref:    [BPAD, CHW]      flattened NCHW input (zero-padded rows)
       slab_ref: [R_TOTAL, 128]   packed constants (see row layout above)
       out_ref:  [BPAD, 128]      sigmoid outputs (only [:B, :OUT] meaningful)."""
    x = x_ref[...]                                             # [8, 1024]
    w_pool = slab_ref[pl.ds(ROW_WPOOL, CHW), :]                # [1024, 128]
    w1 = slab_ref[pl.ds(ROW_W1, D), :]                         # [32, 128]
    w2 = slab_ref[pl.ds(ROW_W2, HID), :]                       # [32, 128]
    biases = slab_ref[pl.ds(ROW_BIAS, 8), :]                   # [8, 128]

    # ---- synthetic backbone (vit_main stand-in); patchify+mean-pool folded
    # into W_pool on the host, so this is a single [8,1024]x[1024,128] MXU op.
    pooled = jnp.dot(x, w_pool,
                     preferred_element_type=jnp.float32)[:, :D]  # [8, D]
    pooled = pooled + biases[0:1, :D]                            # + bp
    mu = jnp.mean(pooled, axis=-1, keepdims=True)
    var = jnp.mean(jnp.square(pooled - mu), axis=-1, keepdims=True)
    norm = (pooled - mu) * jax.lax.rsqrt(var + LN_EPS)           # LN (affine folded)

    # ---- linModel head: [Dropout->]Linear->ReLU->[Dropout->]Linear->Sigmoid
    # Dropout(dropOutLin) is identity in eval mode (folded away).
    h = jnp.dot(norm, w1[:, :HID],
                preferred_element_type=jnp.float32) + biases[1:2, :HID]
    h = jnp.maximum(h, 0.0)                                      # ReLU
    o = jnp.dot(h, w2,
                preferred_element_type=jnp.float32) + biases[2:3, :]
    out_ref[...] = jax.nn.sigmoid(o).astype(out_ref.dtype)       # [8, 128]


# ------------------------------ wrapper ---------------------------------
def fold_params(params):
    """One-time host-side algebraic folding (outside the hot path).

    Returns a single lane-dense [R_TOTAL, 128] f32 slab holding every
    constant the kernel needs."""
    wp = params["wp"]                                          # [CP, D]
    gamma = params["gamma"].reshape(-1)                        # [D]
    beta = params["beta"].reshape(-1)                          # [D]
    w1f = gamma[:, None] * params["w1"]                        # [D, HID]
    b1f = beta @ params["w1"] + params["b1"].reshape(-1)       # [HID]

    # Fold patch extraction + token mean-pool through the patch-embed matmul:
    #   W_pool[c*H*W + h*W + w, d] = wp[c*P*P + (h%P)*P + (w%P), d] / N
    wp_r = wp.reshape(C, P, P, D) / N                          # [c, ph, pw, d]
    w_pool = jnp.broadcast_to(
        wp_r[:, None, :, None, :, :],
        (C, H // P, P, W // P, P, D)).reshape(CHW, D)          # [CHW, D]

    slab = jnp.zeros((R_TOTAL, OUT_PAD), jnp.float32)
    slab = slab.at[ROW_WPOOL:ROW_WPOOL + CHW, :D].set(w_pool)
    slab = slab.at[ROW_W1:ROW_W1 + D, :HID].set(w1f)
    slab = slab.at[ROW_W2:ROW_W2 + HID, :OUT].set(params["w2"])
    slab = slab.at[ROW_BIAS + 0, :D].set(params["bp"].reshape(-1))
    slab = slab.at[ROW_BIAS + 1, :HID].set(b1f)
    slab = slab.at[ROW_BIAS + 2, :OUT].set(params["b2"].reshape(-1))
    return slab


@jax.jit
def pretrained_timm_net_forward(x, slab):
    """x: NCHW float32 [B, C, H, W]; slab: fold_params output -> [B, OUT]."""
    b = x.shape[0]
    # Free view into the flattened image, then pad batch to full sublanes so
    # every DMA tile is an unmasked (8, 128) multiple.
    x_flat = x.astype(jnp.float32).reshape(b, CHW)             # [B, 1024]
    x_pad = jnp.zeros((BPAD, CHW), jnp.float32).at[:b].set(x_flat)

    out_padded = pl.pallas_call(
        fused_forward_kernel,
        out_shape=jax.ShapeDtypeStruct((BPAD, OUT_PAD), jnp.float32),
        in_specs=[pl.BlockSpec(memory_space=pltpu.MemorySpace.VMEM),
                  pl.BlockSpec(memory_space=pltpu.MemorySpace.VMEM)],
        out_specs=pl.BlockSpec(memory_space=pltpu.MemorySpace.VMEM),
    )(x_pad, slab)
    # Padded lanes hold sigmoid(0)=0.5 and padded rows are garbage -> slice.
    return out_padded[:b, :OUT]


# ----------------- pure-JAX reference (unfolded pipeline) ----------------
def _reference_forward(x, params):
    hp = jax.lax.Precision.HIGHEST
    b = x.shape[0]
    xp = x.astype(jnp.float32).reshape(b, C, H // P, P, W // P, P)
    xp = xp.transpose(0, 2, 4, 1, 3, 5).reshape(b, N, CP)
    tok = jnp.einsum("bnc,cd->bnd", xp, params["wp"], precision=hp) + params["bp"]
    pooled = jnp.mean(tok, axis=1)
    mu = jnp.mean(pooled, axis=-1, keepdims=True)
    var = jnp.mean(jnp.square(pooled - mu), axis=-1, keepdims=True)
    feats = (pooled - mu) * jax.lax.rsqrt(var + LN_EPS)
    feats = feats * params["gamma"] + params["beta"]
    hdn = jnp.maximum(jnp.dot(feats, params["w1"], precision=hp) + params["b1"], 0.0)
    return jax.nn.sigmoid(jnp.dot(hdn, params["w2"], precision=hp) + params["b2"])


def init_params(key):
    ks = jax.random.split(key, 6)
    return {
        "wp": jax.random.normal(ks[0], (CP, D), jnp.float32) / jnp.sqrt(CP),
        "bp": jnp.zeros((1, D), jnp.float32),
        "gamma": jnp.ones((1, D), jnp.float32),
        "beta": jnp.zeros((1, D), jnp.float32),
        "w1": jax.random.normal(ks[1], (D, HID), jnp.float32) / jnp.sqrt(D),
        "b1": 0.01 * jax.random.normal(ks[2], (1, HID), jnp.float32),
        "w2": jax.random.normal(ks[3], (HID, OUT), jnp.float32) / jnp.sqrt(HID),
        "b2": 0.01 * jax.random.normal(ks[4], (1, OUT), jnp.float32),
    }


if __name__ == "__main__":
    key = jax.random.PRNGKey(0)
    pkey, xkey = jax.random.split(key)
    params = init_params(pkey)
    slab = jax.device_put(fold_params(params))   # one-time fold, kept resident
    x = jax.random.normal(xkey, (B, C, H, W), jnp.float32)   # NCHW input

    out = pretrained_timm_net_forward(x, slab)
    out = jax.block_until_ready(out)

    ref = _reference_forward(x, params)
    assert out.shape == (B, OUT)
    assert jnp.allclose(out, ref, atol=1e-4, rtol=1e-4)
    print("KERNEL_OK")
</pallas_src>

<mosaic_0001>
module attributes {stable_mosaic.version = 11 : i64} {
  func.func @fused_forward_kernel(%arg0: memref<8x1024xf32, #tpu.memory_space<vmem>>, %arg1: memref<1096x128xf32, #tpu.memory_space<vmem>>, %arg2: memref<8x128xf32, #tpu.memory_space<vmem>>) attributes {dimension_semantics = [], scalar_prefetch = 0 : i64, scratch_operands = 0 : i64, tpu.core_type = #tpu.core_type<tc>} {
    %c0 = arith.constant 0 : index
    %c0_0 = arith.constant 0 : index
    %0 = vector.load %arg0[%c0, %c0_0] : memref<8x1024xf32, #tpu.memory_space<vmem>>, vector<8x1024xf32>
    %c0_1 = arith.constant 0 : index
    %c0_2 = arith.constant 0 : index
    %1 = vector.load %arg1[%c0_1, %c0_2] : memref<1096x128xf32, #tpu.memory_space<vmem>>, vector<1024x128xf32>
    %c1024 = arith.constant 1024 : index
    %c0_3 = arith.constant 0 : index
    %2 = vector.load %arg1[%c1024, %c0_3] : memref<1096x128xf32, #tpu.memory_space<vmem>>, vector<32x128xf32>
    %c1056 = arith.constant 1056 : index
    %c0_4 = arith.constant 0 : index
    %3 = vector.load %arg1[%c1056, %c0_4] : memref<1096x128xf32, #tpu.memory_space<vmem>>, vector<32x128xf32>
    %c1088 = arith.constant 1088 : index
    %c0_5 = arith.constant 0 : index
    %4 = vector.load %arg1[%c1088, %c0_5] : memref<1096x128xf32, #tpu.memory_space<vmem>>, vector<8x128xf32>
    %cst = arith.constant dense<0.000000e+00> : vector<8x128xf32>
    %5 = tpu.matmul %0, %1, %cst {dimension_numbers = #tpu.dot_dimension_numbers<[1], [0], [0], [1], [0, 0, 1, 1], [], []>} : vector<8x1024xf32>, vector<1024x128xf32>, vector<8x128xf32> -> vector<8x128xf32>
    %6 = vector.extract_strided_slice %5 {offsets = [0, 0], sizes = [8, 32], strides = [1, 1]} : vector<8x128xf32> to vector<8x32xf32>
    %7 = vector.extract_strided_slice %4 {offsets = [0, 0], sizes = [1, 32], strides = [1, 1]} : vector<8x128xf32> to vector<1x32xf32>
    %8 = vector.broadcast %7 : vector<1x32xf32> to vector<8x32xf32>
    %9 = arith.addf %6, %8 : vector<8x32xf32>
    %cst_6 = arith.constant dense<0.000000e+00> : vector<8xf32>
    %10 = vector.multi_reduction <add>, %9, %cst_6 [1] : vector<8x32xf32> to vector<8xf32>
    %11 = vector.shape_cast %10 : vector<8xf32> to vector<8x1xf32>
    %cst_7 = arith.constant 3.200000e+01 : f32
    %12 = vector.broadcast %cst_7 : f32 to vector<8x1xf32>
    %13 = arith.divf %11, %12 : vector<8x1xf32>
    %14 = vector.broadcast %13 : vector<8x1xf32> to vector<8x32xf32>
    %15 = arith.subf %9, %14 : vector<8x32xf32>
    %16 = arith.mulf %15, %15 : vector<8x32xf32>
    %cst_8 = arith.constant dense<0.000000e+00> : vector<8xf32>
    %17 = vector.multi_reduction <add>, %16, %cst_8 [1] : vector<8x32xf32> to vector<8xf32>
    %18 = vector.shape_cast %17 : vector<8xf32> to vector<8x1xf32>
    %cst_9 = arith.constant 3.200000e+01 : f32
    %19 = vector.broadcast %cst_9 : f32 to vector<8x1xf32>
    %20 = arith.divf %18, %19 : vector<8x1xf32>
    %21 = vector.broadcast %13 : vector<8x1xf32> to vector<8x32xf32>
    %22 = arith.subf %9, %21 : vector<8x32xf32>
    %cst_10 = arith.constant 9.99999997E-7 : f32
    %23 = vector.broadcast %cst_10 : f32 to vector<8x1xf32>
    %24 = arith.addf %20, %23 : vector<8x1xf32>
    %25 = math.rsqrt %24 : vector<8x1xf32>
    %26 = vector.broadcast %25 : vector<8x1xf32> to vector<8x32xf32>
    %27 = arith.mulf %22, %26 : vector<8x32xf32>
    %28 = vector.extract_strided_slice %2 {offsets = [0, 0], sizes = [32, 32], strides = [1, 1]} : vector<32x128xf32> to vector<32x32xf32>
    %cst_11 = arith.constant dense<0.000000e+00> : vector<8x32xf32>
    %29 = tpu.matmul %27, %28, %cst_11 {dimension_numbers = #tpu.dot_dimension_numbers<[1], [0], [0], [1], [0, 0, 1, 1], [], []>} : vector<8x32xf32>, vector<32x32xf32>, vector<8x32xf32> -> vector<8x32xf32>
    %30 = vector.extract_strided_slice %4 {offsets = [1, 0], sizes = [1, 32], strides = [1, 1]} : vector<8x128xf32> to vector<1x32xf32>
    %31 = vector.broadcast %30 : vector<1x32xf32> to vector<8x32xf32>
    %32 = arith.addf %29, %31 : vector<8x32xf32>
    %cst_12 = arith.constant 0.000000e+00 : f32
    %33 = vector.broadcast %cst_12 : f32 to vector<8x32xf32>
    %34 = arith.maximumf %32, %33 : vector<8x32xf32>
    %cst_13 = arith.constant dense<0.000000e+00> : vector<8x128xf32>
    %35 = tpu.matmul %34, %3, %cst_13 {dimension_numbers = #tpu.dot_dimension_numbers<[1], [0], [0], [1], [0, 0, 1, 1], [], []>} : vector<8x32xf32>, vector<32x128xf32>, vector<8x128xf32> -> vector<8x128xf32>
    %36 = vector.extract_strided_slice %4 {offsets = [2, 0], sizes = [1, 128], strides = [1, 1]} : vector<8x128xf32> to vector<1x128xf32>
    %37 = vector.broadcast %36 : vector<1x128xf32> to vector<8x128xf32>
    %38 = arith.addf %35, %37 : vector<8x128xf32>
    %39 = arith.negf %38 : vector<8x128xf32>
    %40 = math.exp %39 : vector<8x128xf32>
    %cst_14 = arith.constant 1.000000e+00 : f32
    %41 = vector.broadcast %cst_14 : f32 to vector<8x128xf32>
    %42 = arith.addf %41, %40 : vector<8x128xf32>
    %43 = arith.divf %41, %42 : vector<8x128xf32>
    %c0_15 = arith.constant 0 : index
    %c0_16 = arith.constant 0 : index
    %44 = vector.load %arg2[%c0_15, %c0_16] : memref<8x128xf32, #tpu.memory_space<vmem>>, vector<8x128xf32>
    tpu.vector_store %arg2[%c0_15, %c0_16], %43 {strides = array<i32>} : memref<8x128xf32, #tpu.memory_space<vmem>>, vector<8x128xf32>,
    return
  }
}

</mosaic_0001>

<bundles_post_ra>
// kernel: pretrained_timm_net_forward.1
= control target key start
LH: loop header
LB: loop body
LE: loop exit
PB: predicated region body
PF: predicated region fallthrough
CT: control target
= control target key end

     0   :  { %7 = vsyncpa [#allocation3], 0  ;;  %s988_s9 = smov [#allocation2]   ;;  %s1057_s0 = inlined_call_operand.vmem [shape: f32[8,1024], index: 0, kind: input, shape index: {}]   ;;  %s1058_s1 = inlined_call_operand.hbm [shape: f32[1096,128], index: 1, kind: input, shape index: {}]   ;;  %s1059_s2 = inlined_call_operand.vmem [shape: f32[8,128], index: 2, kind: output, shape index: {}]  }
   0x1   :  { %s15_s10 = sshll.u32 %s988_s9, 4  ;;  %s964_s13 = scalar_lea.hbm %s1058_s1, 17536  ;;  %s16_s10 = int_to_ptr.vmem [resolvable:$true] %s15_s10 }
   0x2   :  { %p965_p0 = scmp.ne.s32.totalorder %s1058_s1, %s964_s13  ;;  %p968_p1 = scmp.lt.u32.totalorder %s964_s13, %s1058_s1 }
   0x4   :  { %p970_p2 = pnand %p968_p1, %p965_p0 }
   0x6   :  { %973 = shalt.err (!%p970_p2)
}
   0x7   :  { %s974_s18 = scalar_lea.vmem %s16_s10, 17536  ;;  %p979_p4 = scmp.lt.s32.totalorder %s16_s10, %s16_s10 }
   0x8   :  { %p975_p3 = scmp.ne.s32.totalorder %s16_s10, %s974_s18  ;;  %p980_p5 = scmp.lt.s32.totalorder %s974_s18, %s974_s18 }
   0xa   :  { %p981_p6 = por %p980_p5, %p979_p4 }
   0xc   :  { %p982_p7 = pnand %p981_p6, %p975_p3 }
   0xe   :  { %985 = shalt.err (!%p982_p7)
}
   0xf   :  { %s989_s19 = smov 128   ;;  %s990_s20 = smov 8  }
  0x10   :  { %21 = dma.hbm_to_vmem [thread:$0]  %s1058_s1, 17536, %s16_s10, [#allocation3], %s989_s19, %s989_s19, %s990_s20  }
  0x11   :  { %986 = dma.done.wait [#allocation3], 17536  }
  0x12   :  { %987 = vsyncadd [#allocation3], 4294949760  ;;  %v49_v0 = vld [vmem:[#allocation2 + $0x80] sm:$0xff]  ;;  %v50_v1 = vld [vmem:[#allocation2 + $0x88] sm:$0xff]  ;;  %vm455_vm0 = vcmask 261120   ;;  %vm992_vm1 = vmmov 0  }
  0x13   :  { %v81_v2 = vld [vmem:[#allocation2 + $0x180] sm:$0xff]  ;;  %v812_v3 = vpack.c.bf16 %v50_v1, %v49_v0  ;;  %v82_v4 = vld [vmem:[#allocation2 + $0x188] sm:$0xff]  ;;  %v51_v11 = vld [vmem:[#allocation2 + $0x90] sm:$0xff] }
  0x14   :  { %v33_v5 = vld [vmem:[#allocation2] sm:$0xff]  ;;  %v34_v6 = vld [vmem:[#allocation2 + $0x8] sm:$0xff]  ;;  %v844_v7 = vpack.c.bf16 %v82_v4, %v81_v2  ;;  %v52_v13 = vld [vmem:[#allocation2 + $0x98] sm:$0xff] }
  0x15   :  { %v814_v8 = vpack.c.bf16 %v34_v6, %v33_v5  ;;  %v65_v9 = vld [vmem:[#allocation2 + $0x100] sm:$0xff]  ;;  %v66_v10 = vld [vmem:[#allocation2 + $0x108] sm:$0xff]  ;;  %813 = vmatprep.subr.bf16.mxu0 %v812_v3  ;;  %v83_v14 = vld [vmem:[#allocation2 + $0x190] sm:$0xff]  ;;  %v816_v16 = vpack.c.bf16 %v52_v13, %v51_v11 }
  0x16   :  { %v846_v12 = vpack.c.bf16 %v66_v10, %v65_v9  ;;  %v84_v15 = vld [vmem:[#allocation2 + $0x198] sm:$0xff]  ;;  %845 = vmatprep.subr.bf16.mxu1 %v844_v7  ;;  %v35_v18 = vld [vmem:[#allocation2 + $0x10] sm:$0xff]  ;;  %v53_v23 = vld [vmem:[#allocation2 + $0xa0] sm:$0xff] }
  0x17   :  { %815 = vmatpush3.bf16.msra.mxu0 %v814_v8  ;;  %v848_v17 = vpack.c.bf16 %v84_v15, %v83_v14  ;;  %v36_v19 = vld [vmem:[#allocation2 + $0x18] sm:$0xff]  ;;  %v67_v20 = vld [vmem:[#allocation2 + $0x110] sm:$0xff]  ;;  %v54_v24 = vld [vmem:[#allocation2 + $0xa8] sm:$0xff] }
  0x18   :  { %847 = vmatpush3.bf16.msra.mxu1 %v846_v12  ;;  %v818_v21 = vpack.c.bf16 %v36_v19, %v35_v18  ;;  %v68_v22 = vld [vmem:[#allocation2 + $0x118] sm:$0xff]  ;;  %817 = vmatprep.subr.bf16.mxu0 %v816_v16  ;;  %v820_v26 = vpack.c.bf16 %v54_v24, %v53_v23  ;;  %v85_v27 = vld [vmem:[#allocation2 + $0x1a0] sm:$0xff]  ;;  %v86_v28 = vld [vmem:[#allocation2 + $0x1a8] sm:$0xff] }
  0x19   :  { %849 = vmatprep.subr.bf16.mxu1 %v848_v17  ;;  %v850_v25 = vpack.c.bf16 %v68_v22, %v67_v20  ;;  %v37_v29 = vld [vmem:[#allocation2 + $0x20] sm:$0xff]  ;;  %v852_v30 = vpack.c.bf16 %v86_v28, %v85_v27  ;;  %v38_v31 = vld [vmem:[#allocation2 + $0x28] sm:$0xff]  ;;  %v55_v35 = vld [vmem:[#allocation2 + $0xb0] sm:$0xff] }
  0x1a   :  { %v69_v32 = vld [vmem:[#allocation2 + $0x120] sm:$0xff]  ;;  %v70_v33 = vld [vmem:[#allocation2 + $0x128] sm:$0xff]  ;;  %v822_v34 = vpack.c.bf16 %v38_v31, %v37_v29  ;;  %v56_v36 = vld [vmem:[#allocation2 + $0xb8] sm:$0xff] }
  0x1b   :  { %819 = vmatpush3.bf16.msra.mxu0 %v818_v21  ;;  %v87_v37 = vld [vmem:[#allocation2 + $0x1b0] sm:$0xff]  ;;  %v854_v38 = vpack.c.bf16 %v70_v33, %v69_v32  ;;  %v824_v39 = vpack.c.bf16 %v56_v36, %v55_v35  ;;  %v88_v40 = vld [vmem:[#allocation2 + $0x1b8] sm:$0xff]  ;;  %v57_v46 = vld [vmem:[#allocation2 + $0xc0] sm:$0xff] }
  0x1c   :  { %851 = vmatpush3.bf16.msra.mxu1 %v850_v25  ;;  %821 = vmatprep.subr.bf16.mxu0 %v820_v26  ;;  %v39_v41 = vld [vmem:[#allocation2 + $0x30] sm:$0xff]  ;;  %v40_v42 = vld [vmem:[#allocation2 + $0x38] sm:$0xff]  ;;  %v856_v43 = vpack.c.bf16 %v88_v40, %v87_v37  ;;  %v58_v47 = vld [vmem:[#allocation2 + $0xc8] sm:$0xff] }
  0x1d   :  { %853 = vmatprep.subr.bf16.mxu1 %v852_v30  ;;  %v71_v44 = vld [vmem:[#allocation2 + $0x130] sm:$0xff]  ;;  %v72_v45 = vld [vmem:[#allocation2 + $0x138] sm:$0xff]  ;;  %v89_v48 = vld [vmem:[#allocation2 + $0x1c0] sm:$0xff]  ;;  %v826_v50 = vpack.c.bf16 %v40_v42, %v39_v41  ;;  %v828_v52 = vpack.c.bf16 %v58_v47, %v57_v46 }
  0x1e   :  { %v90_v49 = vld [vmem:[#allocation2 + $0x1c8] sm:$0xff]  ;;  %v858_v51 = vpack.c.bf16 %v72_v45, %v71_v44  ;;  %v41_v53 = vld [vmem:[#allocation2 + $0x40] sm:$0xff]  ;;  %v59_v58 = vld [vmem:[#allocation2 + $0xd0] sm:$0xff] }
  0x1f   :  { %823 = vmatpush3.bf16.msra.mxu0 %v822_v34  ;;  %v42_v54 = vld [vmem:[#allocation2 + $0x48] sm:$0xff]  ;;  %v73_v55 = vld [vmem:[#allocation2 + $0x140] sm:$0xff]  ;;  %v860_v56 = vpack.c.bf16 %v90_v49, %v89_v48  ;;  %v60_v59 = vld [vmem:[#allocation2 + $0xd8] sm:$0xff] }
  0x20   :  { %855 = vmatpush3.bf16.msra.mxu1 %v854_v38  ;;  %825 = vmatprep.subr.bf16.mxu0 %v824_v39  ;;  %v74_v57 = vld [vmem:[#allocation2 + $0x148] sm:$0xff]  ;;  %v91_v60 = vld [vmem:[#allocation2 + $0x1d0] sm:$0xff]  ;;  %v92_v61 = vld [vmem:[#allocation2 + $0x1d8] sm:$0xff]  ;;  %v830_v62 = vpack.c.bf16 %v42_v54, %v41_v53  ;;  %v832_v0 = vpack.c.bf16 %v60_v59, %v59_v58 }
  0x21   :  { %857 = vmatprep.subr.bf16.mxu1 %v856_v43  ;;  %v862_v63 = vpack.c.bf16 %v74_v57, %v73_v55  ;;  %v43_v1 = vld [vmem:[#allocation2 + $0x50] sm:$0xff]  ;;  %v44_v2 = vld [vmem:[#allocation2 + $0x58] sm:$0xff]  ;;  %v864_v4 = vpack.c.bf16 %v92_v61, %v91_v60  ;;  %v61_v6 = vld [vmem:[#allocation2 + $0xe0] sm:$0xff] }
  0x22   :  { %v75_v3 = vld [vmem:[#allocation2 + $0x150] sm:$0xff]  ;;  %v76_v5 = vld [vmem:[#allocation2 + $0x158] sm:$0xff]  ;;  %v62_v7 = vld [vmem:[#allocation2 + $0xe8] sm:$0xff]  ;;  %v834_v10 = vpack.c.bf16 %v44_v2, %v43_v1 }
  0x23   :  { %827 = vmatpush3.bf16.msra.mxu0 %v826_v50  ;;  %v93_v8 = vld [vmem:[#allocation2 + $0x1e0] sm:$0xff]  ;;  %v94_v9 = vld [vmem:[#allocation2 + $0x1e8] sm:$0xff]  ;;  %v866_v13 = vpack.c.bf16 %v76_v5, %v75_v3  ;;  %v836_v14 = vpack.c.bf16 %v62_v7, %v61_v6  ;;  %v28_v17 = vld [vmem:[%s1057_s0 + $0x18] sm:$0xff] }
  0x24   :  { %859 = vmatpush3.bf16.msra.mxu1 %v858_v51  ;;  %829 = vmatprep.subr.bf16.mxu0 %v828_v52  ;;  %v45_v11 = vld [vmem:[#allocation2 + $0x60] sm:$0xff]  ;;  %v46_v12 = vld [vmem:[#allocation2 + $0x68] sm:$0xff]  ;;  %v868_v18 = vpack.c.bf16 %v94_v9, %v93_v8  ;;  %v63_v20 = vld [vmem:[#allocation2 + $0xf0] sm:$0xff] }
  0x25   :  { %861 = vmatprep.subr.bf16.mxu1 %v860_v56  ;;  %v77_v15 = vld [vmem:[#allocation2 + $0x160] sm:$0xff]  ;;  %v26_v16 = vld [vmem:[%s1057_s0 + $0x8] sm:$0xff]  ;;  %v64_v21 = vld [vmem:[#allocation2 + $0xf8] sm:$0xff]  ;;  %304 = vmatprep.mubr.f32.mxu1 %v28_v17  ;;  %v838_v24 = vpack.c.bf16 %v46_v12, %v45_v11 }
  0x26   :  { %v78_v19 = vld [vmem:[#allocation2 + $0x168] sm:$0xff]  ;;  %234 = vmatprep.mubr.f32.mxu0 %v26_v16  ;;  %v95_v22 = vld [vmem:[#allocation2 + $0x1f0] sm:$0xff]  ;;  %v96_v23 = vld [vmem:[#allocation2 + $0x1f8] sm:$0xff]  ;;  %v840_v26 = vpack.c.bf16 %v64_v21, %v63_v20 }
  0x27   :  { %831 = vmatpush3.bf16.msra.mxu0 %v830_v62  ;;  %v870_v25 = vpack.c.bf16 %v78_v19, %v77_v15  ;;  %v47_v27 = vld [vmem:[#allocation2 + $0x70] sm:$0xff]  ;;  %v48_v28 = vld [vmem:[#allocation2 + $0x78] sm:$0xff]  ;;  %v872_v30 = vpack.c.bf16 %v96_v23, %v95_v22  ;;  %v113_v32 = vld [vmem:[#allocation2 + $0x280] sm:$0xff] }
  0x28   :  { %863 = vmatpush3.bf16.msra.mxu1 %v862_v63  ;;  %833 = vmatprep.subr.bf16.mxu0 %v832_v0  ;;  %v79_v29 = vld [vmem:[#allocation2 + $0x170] sm:$0xff]  ;;  %v80_v31 = vld [vmem:[#allocation2 + $0x178] sm:$0xff]  ;;  %v114_v33 = vld [vmem:[#allocation2 + $0x288] sm:$0xff]  ;;  %v842_v36 = vpack.c.bf16 %v48_v28, %v47_v27 }
  0x29   :  { %865 = vmatprep.subr.bf16.mxu1 %v864_v4  ;;  %v145_v34 = vld [vmem:[#allocation2 + $0x380] sm:$0xff]  ;;  %v146_v35 = vld [vmem:[#allocation2 + $0x388] sm:$0xff]  ;;  %v874_v37 = vpack.c.bf16 %v80_v31, %v79_v29  ;;  %v876_v38 = vpack.c.bf16 %v114_v33, %v113_v32  ;;  %v115_v44 = vld [vmem:[#allocation2 + $0x290] sm:$0xff] }
  0x2a   :  { %v97_v39 = vld [vmem:[#allocation2 + $0x200] sm:$0xff]  ;;  %v98_v40 = vld [vmem:[#allocation2 + $0x208] sm:$0xff]  ;;  %v908_v42 = vpack.c.bf16 %v146_v35, %v145_v34  ;;  %v116_v45 = vld [vmem:[#allocation2 + $0x298] sm:$0xff] }
  0x2b   :  { %835 = vmatpush3.bf16.msra.mxu0 %v834_v10  ;;  %v129_v41 = vld [vmem:[#allocation2 + $0x300] sm:$0xff]  ;;  %v130_v43 = vld [vmem:[#allocation2 + $0x308] sm:$0xff]  ;;  %v147_v46 = vld [vmem:[#allocation2 + $0x390] sm:$0xff]  ;;  %v878_v50 = vpack.c.bf16 %v98_v40, %v97_v39  ;;  %v880_v52 = vpack.c.bf16 %v116_v45, %v115_v44 }
  0x2c   :  { %867 = vmatpush3.bf16.msra.mxu1 %v866_v13  ;;  %837 = vmatprep.subr.bf16.mxu0 %v836_v14  ;;  %v148_v47 = vld [vmem:[#allocation2 + $0x398] sm:$0xff]  ;;  %v25_v48 = vld [vmem:[%s1057_s0] sm:$0xff]  ;;  %v27_v49 = vld [vmem:[%s1057_s0 + $0x10] sm:$0xff]  ;;  %v910_v51 = vpack.c.bf16 %v130_v43, %v129_v41 }
  0x2d   :  { %869 = vmatprep.subr.bf16.mxu1 %v868_v18  ;;  %v99_v53 = vld [vmem:[#allocation2 + $0x210] sm:$0xff]  ;;  %v100_v54 = vld [vmem:[#allocation2 + $0x218] sm:$0xff]  ;;  %v912_v56 = vpack.c.bf16 %v148_v47, %v147_v46  ;;  %v117_v58 = vld [vmem:[#allocation2 + $0x2a0] sm:$0xff] }
  0x2e   :  { %v131_v55 = vld [vmem:[#allocation2 + $0x310] sm:$0xff]  ;;  %v132_v57 = vld [vmem:[#allocation2 + $0x318] sm:$0xff]  ;;  %v118_v59 = vld [vmem:[#allocation2 + $0x2a8] sm:$0xff]  ;;  %v882_v62 = vpack.c.bf16 %v100_v54, %v99_v53 }
  0x2f   :  { %839 = vmatpush3.bf16.msra.mxu0 %v838_v24  ;;  %v149_v60 = vld [vmem:[#allocation2 + $0x3a0] sm:$0xff]  ;;  %v150_v61 = vld [vmem:[#allocation2 + $0x3a8] sm:$0xff]  ;;  %v914_v63 = vpack.c.bf16 %v132_v57, %v131_v55  ;;  %v884_v0 = vpack.c.bf16 %v118_v59, %v117_v58  ;;  %v119_v6 = vld [vmem:[#allocation2 + $0x2b0] sm:$0xff] }
  0x30   :  { %871 = vmatpush3.bf16.msra.mxu1 %v870_v25  ;;  %841 = vmatprep.subr.bf16.mxu0 %v840_v26  ;;  %v101_v1 = vld [vmem:[#allocation2 + $0x220] sm:$0xff]  ;;  %v102_v2 = vld [vmem:[#allocation2 + $0x228] sm:$0xff]  ;;  %v916_v4 = vpack.c.bf16 %v150_v61, %v149_v60  ;;  %v120_v7 = vld [vmem:[#allocation2 + $0x2b8] sm:$0xff] }
  0x31   :  { %873 = vmatprep.subr.bf16.mxu1 %v872_v30  ;;  %v133_v3 = vld [vmem:[#allocation2 + $0x320] sm:$0xff]  ;;  %v134_v5 = vld [vmem:[#allocation2 + $0x328] sm:$0xff]  ;;  %v151_v8 = vld [vmem:[#allocation2 + $0x3b0] sm:$0xff]  ;;  %v886_v10 = vpack.c.bf16 %v102_v2, %v101_v1  ;;  %v888_v12 = vpack.c.bf16 %v120_v7, %v119_v6 }
  0x32   :  { %v152_v9 = vld [vmem:[#allocation2 + $0x3b8] sm:$0xff]  ;;  %v918_v11 = vpack.c.bf16 %v134_v5, %v133_v3  ;;  %v103_v13 = vld [vmem:[#allocation2 + $0x230] sm:$0xff]  ;;  %v121_v18 = vld [vmem:[#allocation2 + $0x2c0] sm:$0xff] }
  0x33   :  { %843 = vmatpush3.bf16.msra.mxu0 %v842_v36  ;;  %v104_v14 = vld [vmem:[#allocation2 + $0x238] sm:$0xff]  ;;  %v135_v15 = vld [vmem:[#allocation2 + $0x330] sm:$0xff]  ;;  %v920_v16 = vpack.c.bf16 %v152_v9, %v151_v8  ;;  %v122_v19 = vld [vmem:[#allocation2 + $0x2c8] sm:$0xff] }
  0x34   :  { %875 = vmatpush3.bf16.msra.mxu1 %v874_v37  ;;  %877 = vmatprep.subr.bf16.mxu0 %v876_v38  ;;  %v136_v17 = vld [vmem:[#allocation2 + $0x338] sm:$0xff]  ;;  %v153_v20 = vld [vmem:[#allocation2 + $0x3c0] sm:$0xff]  ;;  %v154_v21 = vld [vmem:[#allocation2 + $0x3c8] sm:$0xff]  ;;  %v890_v22 = vpack.c.bf16 %v104_v14, %v103_v13  ;;  %v892_v26 = vpack.c.bf16 %v122_v19, %v121_v18 }
  0x35   :  { %909 = vmatprep.subr.bf16.mxu1 %v908_v42  ;;  %v30_v23 = vld [vmem:[%s1057_s0 + $0x28] sm:$0xff]  ;;  %v32_v24 = vld [vmem:[%s1057_s0 + $0x38] sm:$0xff]  ;;  %v922_v25 = vpack.c.bf16 %v136_v17, %v135_v15  ;;  %v105_v27 = vld [vmem:[#allocation2 + $0x240] sm:$0xff]  ;;  %v924_v30 = vpack.c.bf16 %v154_v21, %v153_v20  ;;  %v450_v15 = vlaneseq }
  0x36   :  { %235 = vmatmul.mubr.f32.vlgmr.msra.gmra.mrb[0].mxu0 %v25_v48  ;;  %v106_v28 = vld [vmem:[#allocation2 + $0x248] sm:$0xff]  ;;  %v137_v29 = vld [vmem:[#allocation2 + $0x340] sm:$0xff]  ;;  %v123_v32 = vld [vmem:[#allocation2 + $0x2d0] sm:$0xff] }
  0x37   :  { %305 = vmatmul.mubr.f32.vlgmr.msra.gmra.mrb[0].mxu1 %v27_v49  ;;  %879 = vmatpush3.bf16.msra.mxu0 %v878_v50  ;;  %v138_v31 = vld [vmem:[#allocation2 + $0x348] sm:$0xff]  ;;  %v124_v33 = vld [vmem:[#allocation2 + $0x2d8] sm:$0xff]  ;;  %v155_v34 = vld [vmem:[#allocation2 + $0x3d0] sm:$0xff]  ;;  %v894_v36 = vpack.c.bf16 %v106_v28, %v105_v27 }
  0x38   :  { %911 = vmatpush3.bf16.msra.mxu1 %v910_v51  ;;  %881 = vmatprep.subr.bf16.mxu0 %v880_v52  ;;  %v156_v35 = vld [vmem:[#allocation2 + $0x3d8] sm:$0xff]  ;;  %v926_v37 = vpack.c.bf16 %v138_v31, %v137_v29  ;;  %v896_v38 = vpack.c.bf16 %v124_v33, %v123_v32  ;;  %v107_v39 = vld [vmem:[#allocation2 + $0x250] sm:$0xff]  ;;  %v125_v44 = vld [vmem:[#allocation2 + $0x2e0] sm:$0xff] }
  0x39   :  { %913 = vmatprep.subr.bf16.mxu1 %v912_v56  ;;  %374 = vmatprep.mubr.f32.mxu0 %v30_v23  ;;  %v108_v40 = vld [vmem:[#allocation2 + $0x258] sm:$0xff]  ;;  %v139_v41 = vld [vmem:[#allocation2 + $0x350] sm:$0xff]  ;;  %v928_v42 = vpack.c.bf16 %v156_v35, %v155_v34  ;;  %v126_v45 = vld [vmem:[#allocation2 + $0x2e8] sm:$0xff] }
  0x3a   :  { %444 = vmatprep.mubr.f32.mxu1 %v32_v24  ;;  %v140_v43 = vld [vmem:[#allocation2 + $0x358] sm:$0xff]  ;;  %v157_v46 = vld [vmem:[#allocation2 + $0x3e0] sm:$0xff]  ;;  %v158_v47 = vld [vmem:[#allocation2 + $0x3e8] sm:$0xff]  ;;  %v898_v48 = vpack.c.bf16 %v108_v40, %v107_v39  ;;  %v900_v50 = vpack.c.bf16 %v126_v45, %v125_v44 }
  0x3b   :  { %883 = vmatpush3.bf16.msra.mxu0 %v882_v62  ;;  %v930_v49 = vpack.c.bf16 %v140_v43, %v139_v41  ;;  %v109_v51 = vld [vmem:[#allocation2 + $0x260] sm:$0xff]  ;;  %v110_v52 = vld [vmem:[#allocation2 + $0x268] sm:$0xff]  ;;  %v932_v54 = vpack.c.bf16 %v158_v47, %v157_v46  ;;  %v127_v56 = vld [vmem:[#allocation2 + $0x2f0] sm:$0xff] }
  0x3c   :  { %915 = vmatpush3.bf16.msra.mxu1 %v914_v63  ;;  %885 = vmatprep.subr.bf16.mxu0 %v884_v0  ;;  %v141_v53 = vld [vmem:[#allocation2 + $0x360] sm:$0xff]  ;;  %v142_v55 = vld [vmem:[#allocation2 + $0x368] sm:$0xff]  ;;  %v128_v57 = vld [vmem:[#allocation2 + $0x2f8] sm:$0xff]  ;;  %v902_v60 = vpack.c.bf16 %v110_v52, %v109_v51 }
  0x3d   :  { %917 = vmatprep.subr.bf16.mxu1 %v916_v4  ;;  %v159_v58 = vld [vmem:[#allocation2 + $0x3f0] sm:$0xff]  ;;  %v160_v59 = vld [vmem:[#allocation2 + $0x3f8] sm:$0xff]  ;;  %v934_v61 = vpack.c.bf16 %v142_v55, %v141_v53  ;;  %v904_v62 = vpack.c.bf16 %v128_v57, %v127_v56  ;;  %v29_v6 = vld [vmem:[%s1057_s0 + $0x20] sm:$0xff] }
  0x3e   :  { %v111_v63 = vld [vmem:[#allocation2 + $0x270] sm:$0xff]  ;;  %v112_v0 = vld [vmem:[#allocation2 + $0x278] sm:$0xff]  ;;  %v936_v1 = vpack.c.bf16 %v160_v59, %v159_v58  ;;  %v169_v21 = vld [vmem:[#allocation2 + $0x440] sm:$0xff] }
  0x3f   :  { %887 = vmatpush3.bf16.msra.mxu0 %v886_v10  ;;  %v143_v2 = vld [vmem:[#allocation2 + $0x370] sm:$0xff]  ;;  %v144_v3 = vld [vmem:[#allocation2 + $0x378] sm:$0xff]  ;;  %v906_v4 = vpack.c.bf16 %v112_v0, %v111_v63  ;;  %v161_v35 = vld [vmem:[#allocation2 + $0x400] sm:$0xff] }
  0x40   :  { %919 = vmatpush3.bf16.msra.mxu1 %v918_v11  ;;  %889 = vmatprep.subr.bf16.mxu0 %v888_v12  ;;  %v938_v5 = vpack.c.bf16 %v144_v3, %v143_v2  ;;  %v31_v7 = vld [vmem:[%s1057_s0 + $0x30] sm:$0xff]  ;;  %v164_v40 = vld [vmem:[#allocation2 + $0x418] sm:$0xff]  ;;  %v165_v43 = vld [vmem:[#allocation2 + $0x420] sm:$0xff] }
  0x41   :  { %921 = vmatprep.subr.bf16.mxu1 %v920_v16  ;;  %v1045_v16 = vshrl.u32 %v450_v15, 7  ;;  %v163_v39 = vld [vmem:[#allocation2 + $0x410] sm:$0xff]  ;;  %v166_v44 = vld [vmem:[#allocation2 + $0x428] sm:$0xff]  ;;  %v168_v52 = vld [vmem:[#allocation2 + $0x438] sm:$0xff] }
  0x42   :  { %v944_v41 = vpack.c.bf16 %v164_v40, %v163_v39  ;;  %v947_v45 = vpack.c.bf16 %v166_v44, %v165_v43  ;;  %v167_v51 = vld [vmem:[#allocation2 + $0x430] sm:$0xff] }
  0x43   :  { %891 = vmatpush3.bf16.msra.mxu0 %v890_v22  ;;  %v452_v18 = vsub.s32 0, %v1045_v16  ;;  %v950_v53 = vpack.c.bf16 %v168_v52, %v167_v51 }
  0x44   :  { %923 = vmatpush3.bf16.msra.mxu1 %v922_v25  ;;  %893 = vmatprep.subr.bf16.mxu0 %v892_v26 }
  0x45   :  { %925 = vmatprep.subr.bf16.mxu1 %v924_v30  ;;  %v453_v26 = vrot.slane %v169_v21, %v452_v18 }
  0x47   :  { %895 = vmatpush3.bf16.msra.mxu0 %v894_v36  ;;  %v162_v36 = vld [vmem:[#allocation2 + $0x408] sm:$0xff] }
  0x48   :  { %927 = vmatpush3.bf16.msra.mxu1 %v926_v37  ;;  %897 = vmatprep.subr.bf16.mxu0 %v896_v38  ;;  %v941_v37 = vpack.c.bf16 %v162_v36, %v161_v35  ;;  %v991_v38 = vmov 0.0|0.0  }
  0x49   :  { %929 = vmatprep.subr.bf16.mxu1 %v928_v42  ;;  %v993_v42 = vmov 0.0  }
  0x4b   :  { %899 = vmatpush3.bf16.msra.mxu0 %v898_v48 }
  0x4c   :  { %931 = vmatpush3.bf16.msra.mxu1 %v930_v49  ;;  %901 = vmatprep.subr.bf16.mxu0 %v900_v50 }
  0x4d   :  { %933 = vmatprep.subr.bf16.mxu1 %v932_v54  ;;  %v472_v54 = vsub.s32 1, %v1045_v16 }
  0x4f   :  { %903 = vmatpush3.bf16.msra.mxu0 %v902_v60  ;;  %v473_v55 = vrot.slane %v169_v21, %v472_v54  ;;  %v550_v60 = vsub.s32 2, %v1045_v16 }
  0x50   :  { %935 = vmatpush3.bf16.msra.mxu1 %v934_v61  ;;  %905 = vmatprep.subr.bf16.mxu0 %v904_v62 }
  0x51   :  { %937 = vmatprep.subr.bf16.mxu1 %v936_v1  ;;  %v551_v61 = vrot.slane %v169_v21, %v550_v60 }
  0x53   :  { %907 = vmatpush3.bf16.msra.mxu0 %v906_v4 }
  0x54   :  { %939 = vmatpush3.bf16.msra.mxu1 %v938_v5  ;;  %940 = vmatprep.subr.bf16.mxu0 %v991_v38 }
  0x55   :  { %946 = vmatprep.subr.bf16.mxu1 %v991_v38 }
  0x56   :  { %375 = vmatmul.mubr.f32.vlgmr.msra.gmra.mrb[2].mxu0 %v29_v6 }
  0x57   :  { %445 = vmatmul.mubr.f32.vlgmr.msra.gmra.mrb[2].mxu1 %v31_v7  ;;  %942 = vmatpush3.bf16.msra.mxu0 %v941_v37 }
  0x58   :  { %943 = vmatprep.subr.bf16.mxu0 %v991_v38  ;;  %798 = vmatprep.mubr.msk.f32.mxu0 %vm992_vm1, %v993_v42 }
  0x59   :  { %809 = vmatprep.mubr.msk.f32.mxu1 %vm992_vm1, %v993_v42  ;;  %948 = vmatpush3.bf16.msra.mxu1 %v947_v45 }
  0x5a   :  { %949 = vmatprep.subr.bf16.mxu1 %v991_v38 }
  0x5b   :  { %945 = vmatpush3.bf16.msra.mxu0 %v944_v41 }
  0x5d   :  { %951 = vmatpush3.bf16.msra.mxu1 %v950_v53 }
 0x109   :  { %v672_v8 = vpop.f32.mrb[0].mxu0 }
 0x10a   :  { %v707_v9 = vpop.f32.mrb[0].mxu1  ;;  %v673_v10 = vpop.f32.mrb[1].mxu0 }
 0x10b   :  { %v674_v11 = vadd.f32 %v673_v10, %v672_v8  ;;  %v708_v12 = vpop.f32.mrb[1].mxu1 }
 0x10c   :  { %v709_v13 = vadd.f32 %v708_v12, %v707_v9 }
 0x10e   :  { %v307_v14 = vadd.f32 %v709_v13, %v674_v11 }
 0x129   :  { %v742_v17 = vpop.f32.mrb[2].mxu0 }
 0x12a   :  { %v743_v19 = vpop.f32.mrb[3].mxu0  ;;  %v777_v20 = vpop.f32.mrb[2].mxu1 }
 0x12b   :  { %v744_v22 = vadd.f32 %v743_v19, %v742_v17  ;;  %v778_v23 = vpop.f32.mrb[3].mxu1 }
 0x12c   :  { %v779_v24 = vadd.f32 %v778_v23, %v777_v20 }
 0x12d   :  { %v377_v25 = vadd.f32 %v744_v22, %v307_v14 }
 0x12f   :  { %v447_v27 = vadd.f32 %v779_v24, %v377_v25 }
 0x131   :  { %v454_v28 = vadd.f32 %v453_v26, %v447_v27 }
 0x133   :  { %v456_v29 = vsel %vm455_vm0, %v454_v28, 0.0 }
 0x134   :  { %457 = vadd.xlane.f32.xlu0 %v456_v29 }
 0x1c1   :  { %v458_v30 = vpop.xlane.xlu0 %457 }
 0x1c2   :  { %v460_v31 = vmul.f32 0.03125, %v458_v30 }
 0x1c4   :  { %v461_v32 = vsub.f32 %v454_v28, %v460_v31 }
 0x1c6   :  { %v462_v33 = vmul.f32 %v461_v32, %v461_v32 }
 0x1c8   :  { %v463_v34 = vsel %vm455_vm0, %v462_v33, 0.0 }
 0x1c9   :  { %464 = vadd.xlane.f32.xlu0 %v463_v34 }
 0x256   :  { %v465_v46 = vpop.xlane.xlu0 %464 }
 0x257   :  { %v466_v47 = vmul.f32 0.03125, %v465_v46 }
 0x259   :  { %v467_v48 = vadd.f32 1e-06, %v466_v47 }
 0x25b   :  { %958 = vrsqrt.f32 %v467_v48 }
 0x265   :  { %v959_v49 = vpop.eup %958 }
 0x266   :  { %v469_v50 = vmul.f32 %v959_v49, %v461_v32 }
 0x268   :  { %799 = vmatmul.mubr.msk.f32.vlgmr.msra.gmra.mrb[4].mxu0 %vm455_vm0, %v469_v50 }
 0x33b   :  { %v543_v56 = vpop.f32.mrb[4].mxu0 }
 0x33c   :  { %v544_v57 = vadd.f32 %v543_v56, %v473_v55  ;;  %v800_v58 = vpop.f32.mrb[5].mxu0 }
 0x33e   :  { %v547_v59 = vmax.f32 %v544_v57, 0.0 }
 0x340   :  { %810 = vmatmul.mubr.msk.f32.vlgmr.msra.gmra.mrb[4].mxu1 %vm455_vm0, %v547_v59 }
 0x413   :  { %v621_v62 = vpop.f32.mrb[4].mxu1 }
 0x414   :  { %v622_v63 = vadd.f32 %v621_v62, %v551_v61  ;;  %v811_v0 = vpop.f32.mrb[5].mxu1 }
 0x416   :  { %v639_v1 = vmul.f32 -1.442695, %v622_v63 }
 0x418   :  { %960 = vpow2.f32 %v639_v1 }
 0x422   :  { %v961_v2 = vpop.eup %960 }
 0x423   :  { %v628_v3 = vadd.f32 1.0, %v961_v2 }
 0x425   :  { %962 = vrcp.f32 %v628_v3 }
 0x42f   :  { %v963_v4 = vpop.eup %962 }
 0x430   :  { %631 = vst [vmem:[%s1059_s2] sm:$0xff] %v963_v4 }
 0x431   :  { %636 = vsyncpa [#allocation3], 1 }

</bundles_post_ra>
